<compile_context>
chip_gen: v7x
topology: tpu7x:2x2x1
jax: 0.10.0
libtpu: 0.0.40
codegen_flags: <defaults>
</compile_context>

<pallas_src>
import functools

import jax
import jax.numpy as jnp
from jax.experimental import pallas as pl
from jax.experimental.pallas import tpu as pltpu


# Hardware-driven tile caps (MXU-friendly, lane-dense).  Actual tiles shrink
# to the padded problem dims when the problem is smaller than a cap.
_TILE_M_MAX = 256   # batch rows per step (multiple of 8)
_TILE_N_MAX = 256   # output features per step (multiple of 128 -> unmasked vst)
_TILE_K_MAX = 512   # contraction chunk per step (multiple of 128)


def _round_up(x, m):
    return ((x + m - 1) // m) * m


def _engine_kernel_acc(x_ref, w_ref, b_ref, o_ref, acc_ref):
    """One (tm, tn) output tile; K accumulated across grid axis 2 (K > 1 tiles)."""
    k = pl.program_id(2)

    @pl.when(k == 0)
    def _():
        acc_ref[...] = jnp.zeros_like(acc_ref)

    acc_ref[...] += jnp.dot(x_ref[...], w_ref[...],
                            preferred_element_type=jnp.float32)

    @pl.when(k == pl.num_programs(2) - 1)
    def _():
        # Bias is applied exactly once, in f32, in the epilogue.
        o_ref[...] = (acc_ref[...] + b_ref[...]).astype(o_ref.dtype)


def _engine_kernel_single_k(x_ref, w_ref, b_ref, o_ref):
    """Fast path when the whole contraction fits in one K tile: no scratch."""
    o_ref[...] = (jnp.dot(x_ref[...], w_ref[...],
                          preferred_element_type=jnp.float32)
                  + b_ref[...]).astype(o_ref.dtype)


@functools.partial(jax.jit, static_argnames=("h_out",))
def _run_engine(x, w_pad, b_pad, *, h_out):
    """Equivalent of move_to_engine + run_engine + merge_output (full batch)."""
    batch, h_in = x.shape
    pad_k, pad_n = w_pad.shape
    out_dtype = x.dtype

    # Tile sizes: either the hardware cap or the full (padded) dim.
    tm = min(_TILE_M_MAX, _round_up(batch, 8))
    pad_m = _round_up(batch, tm)
    tn = min(_TILE_N_MAX, pad_n)
    tk = min(_TILE_K_MAX, pad_k)
    nk = pad_k // tk

    # Zero-pad activations to tile multiples and cast to bf16 once (half the
    # HBM bytes for x; MXU runs bf16 at 2x f32 throughput).
    x_p = jnp.pad(x, ((0, pad_m - batch), (0, pad_k - h_in))).astype(jnp.bfloat16)

    cost = pl.CostEstimate(
        flops=2 * pad_m * pad_n * pad_k,
        transcendentals=0,
        bytes_accessed=(pad_m * pad_k * 2          # x (bf16)
                        + pad_k * pad_n * 2        # W (bf16)
                        + pad_m * pad_n * jnp.dtype(out_dtype).itemsize
                        + pad_n * 4),              # bias (f32)
    )

    if nk == 1:
        # Whole contraction in one shot per output tile: skip the f32 VMEM
        # accumulator entirely (saves a scratch round-trip per tile).
        out_p = pl.pallas_call(
            _engine_kernel_single_k,
            out_shape=jax.ShapeDtypeStruct((pad_m, pad_n), out_dtype),
            grid_spec=pltpu.PrefetchScalarGridSpec(
                num_scalar_prefetch=0,
                grid=(pad_m // tm, pad_n // tn),
                in_specs=[
                    pl.BlockSpec((tm, pad_k), lambda i, j: (i, 0)),   # x tile
                    pl.BlockSpec((pad_k, tn), lambda i, j: (0, j)),   # W tile
                    pl.BlockSpec((1, tn), lambda i, j: (0, j)),       # bias tile
                ],
                out_specs=pl.BlockSpec((tm, tn), lambda i, j: (i, j)),
            ),
            compiler_params=pltpu.CompilerParams(
                dimension_semantics=("parallel", "parallel"),
            ),
            cost_estimate=cost,
        )(x_p, w_pad, b_pad)
    else:
        out_p = pl.pallas_call(
            _engine_kernel_acc,
            out_shape=jax.ShapeDtypeStruct((pad_m, pad_n), out_dtype),
            grid_spec=pltpu.PrefetchScalarGridSpec(
                num_scalar_prefetch=0,
                grid=(pad_m // tm, pad_n // tn, nk),
                in_specs=[
                    pl.BlockSpec((tm, tk), lambda i, j, k: (i, k)),   # x tile
                    pl.BlockSpec((tk, tn), lambda i, j, k: (k, j)),   # W tile
                    pl.BlockSpec((1, tn), lambda i, j, k: (0, j)),    # bias tile
                ],
                # Same output block across K -> accumulator stays resident;
                # rows are written contiguously, preserving torch.cat(dim=0)
                # semantics.
                out_specs=pl.BlockSpec((tm, tn), lambda i, j, k: (i, j)),
                scratch_shapes=[pltpu.VMEM((tm, tn), jnp.float32)],
            ),
            compiler_params=pltpu.CompilerParams(
                dimension_semantics=("parallel", "parallel", "arbitrary"),
            ),
            cost_estimate=cost,
        )(x_p, w_pad, b_pad)

    # Strip the padding rows/cols.
    return out_p[:batch, :h_out]


class TRTModuleTPU:
    """Mirror of TRTModule: synthetic engine with one input / one output binding."""

    def __init__(self, h_in, h_out, num_worker):
        self.num_worker = num_worker
        self.h_in = h_in
        self.h_out = h_out

        # Deterministic "engine" parameters (stand-in for the serialized engine).
        kw, kb = jax.random.split(jax.random.PRNGKey(0))
        w = jax.random.normal(kw, (h_in, h_out), jnp.float32) * 0.05
        b = jax.random.normal(kb, (1, h_out), jnp.float32) * 0.05

        # Pad K/N up to lane-dense tile multiples once at construction time.
        tn = min(_TILE_N_MAX, _round_up(h_out, 128))
        tk = min(_TILE_K_MAX, _round_up(h_in, 128))
        pad_n = _round_up(h_out, tn)
        pad_k = _round_up(h_in, tk)

        # bf16 weights: 2x MXU throughput + half the weight DMA bytes.
        self.w = jnp.pad(w, ((0, pad_k - h_in), (0, pad_n - h_out))).astype(jnp.bfloat16)
        # Bias stays f32: applied once in the f32 epilogue (no bf16 VPU on v5e).
        self.b = jnp.pad(b, ((0, 0), (0, pad_n - h_out)))

    def __call__(self, *inputs, **kw_args):
        # forward(): positional then keyword args become input_0, input_1, ...
        all_inputs = list(inputs) + [kw_args[k] for k in kw_args]
        assert len(all_inputs) == 1, "synthetic engine has one input binding"
        x = all_inputs[0]
        # Mirrors the fixed-shape per-worker engine bindings of the original.
        assert x.shape[0] % self.num_worker == 0, "equal torch.chunk split assumed"
        # chunk(num_worker) -> per-worker execute -> cat(dim=0) is a row-wise
        # identity for this engine; the tiled kernel writes output rows
        # contiguously, so the semantics are preserved without tying the grid
        # to num_worker.
        out = _run_engine(x, self.w, self.b, h_out=self.h_out)
        # single output binding -> return the tensor itself (not a list)
        return out


if __name__ == "__main__":
    num_worker = 2
    batch, h_in, h_out = 16, 64, 48  # small; exercises M/N/K padding paths

    key = jax.random.PRNGKey(0)
    x = jax.random.normal(key, (batch, h_in), jnp.float32)

    module = TRTModuleTPU(h_in, h_out, num_worker=num_worker)
    out = module(x)
    out = jax.block_until_ready(out)

    # Plain-JAX reference of the synthetic engine (same bf16-rounded operands).
    x_bf = x.astype(jnp.bfloat16).astype(jnp.float32)
    w_f = module.w[:h_in, :h_out].astype(jnp.float32)
    b_f = module.b[:, :h_out]
    ref = x_bf @ w_f + b_f

    assert out.shape == (batch, h_out)
    assert jnp.max(jnp.abs(out - ref)) < 1e-3

    print("KERNEL_OK")
</pallas_src>

<mosaic_0001>
module attributes {stable_mosaic.version = 11 : i64} {
  func.func @_engine_kernel_single_k(%arg0: i32, %arg1: i32, %arg2: memref<16x128xbf16, #tpu.memory_space<vmem>>, %arg3: memref<128x128xbf16, #tpu.memory_space<vmem>>, %arg4: memref<1x128xf32, #tpu.memory_space<vmem>>, %arg5: memref<16x128xf32, #tpu.memory_space<vmem>>) attributes {dimension_semantics = [#tpu.dimension_semantics<parallel>, #tpu.dimension_semantics<parallel>], iteration_bounds = array<i64: 1, 1>, scalar_prefetch = 0 : i64, scratch_operands = 0 : i64, tpu.core_type = #tpu.core_type<tc>, window_params = [{transform_indices = @transform_0, window_bounds = array<i64: 16, 128>}, {transform_indices = @transform_1, window_bounds = array<i64: 128, 128>}, {transform_indices = @transform_2, window_bounds = array<i64: 1, 128>}, {transform_indices = @transform_3, window_bounds = array<i64: 16, 128>}]} {
    %c0 = arith.constant 0 : index
    %c0_0 = arith.constant 0 : index
    %0 = vector.load %arg2[%c0, %c0_0] : memref<16x128xbf16, #tpu.memory_space<vmem>>, vector<16x128xbf16>
    %c0_1 = arith.constant 0 : index
    %c0_2 = arith.constant 0 : index
    %1 = vector.load %arg3[%c0_1, %c0_2] : memref<128x128xbf16, #tpu.memory_space<vmem>>, vector<128x128xbf16>
    %cst = arith.constant dense<0.000000e+00> : vector<16x128xf32>
    %2 = tpu.matmul %0, %1, %cst {dimension_numbers = #tpu.dot_dimension_numbers<[1], [0], [0], [1], [0, 0, 1, 1], [], []>} : vector<16x128xbf16>, vector<128x128xbf16>, vector<16x128xf32> -> vector<16x128xf32>
    %c0_3 = arith.constant 0 : index
    %c0_4 = arith.constant 0 : index
    %3 = vector.load %arg4[%c0_3, %c0_4] : memref<1x128xf32, #tpu.memory_space<vmem>>, vector<1x128xf32>
    %4 = vector.broadcast %3 : vector<1x128xf32> to vector<16x128xf32>
    %5 = arith.addf %2, %4 : vector<16x128xf32>
    %c0_5 = arith.constant 0 : index
    %c0_6 = arith.constant 0 : index
    %6 = vector.load %arg5[%c0_5, %c0_6] : memref<16x128xf32, #tpu.memory_space<vmem>>, vector<16x128xf32>
    tpu.vector_store %arg5[%c0_5, %c0_6], %5 {strides = array<i32>} : memref<16x128xf32, #tpu.memory_space<vmem>>, vector<16x128xf32>,
    return
  }
  func.func @transform_0(%arg0: i32, %arg1: i32) -> (i32, i32) {
    %c0_i32 = arith.constant 0 : i32
    %c0_i32_0 = arith.constant 0 : i32
    return %arg0, %c0_i32 : i32, i32
  }
  func.func @transform_1(%arg0: i32, %arg1: i32) -> (i32, i32) {
    %c0_i32 = arith.constant 0 : i32
    %c0_i32_0 = arith.constant 0 : i32
    return %c0_i32, %arg1 : i32, i32
  }
  func.func @transform_2(%arg0: i32, %arg1: i32) -> (i32, i32) {
    %c0_i32 = arith.constant 0 : i32
    %c0_i32_0 = arith.constant 0 : i32
    return %c0_i32, %arg1 : i32, i32
  }
  func.func @transform_3(%arg0: i32, %arg1: i32) -> (i32, i32) {
    %c0_i32 = arith.constant 0 : i32
    return %arg0, %arg1 : i32, i32
  }
}

</mosaic_0001>

<bundles_post_ra>
// kernel: _run_engine.1
= control target key start
LH: loop header
LB: loop body
LE: loop exit
PB: predicated region body
PF: predicated region fallthrough
CT: control target
= control target key end

     0   :  { %8 = vsyncpa [#allocation3], 0  ;;  %s331_s0 = inlined_call_operand.vmem [shape: bf16[16,128], index: 0, kind: input, shape index: {}]   ;;  %s332_s1 = inlined_call_operand.hbm [shape: bf16[128,128], index: 1, kind: input, shape index: {}]   ;;  %s333_s2 = inlined_call_operand.vmem [shape: f32[1,128], index: 2, kind: input, shape index: {}]   ;;  %s334_s3 = inlined_call_operand.hbm [shape: f32[16,128], index: 3, kind: output, shape index: {}]  }
   0x1   :  { %9 = vsyncpa [#allocation4], 0  ;;  %s273_s12 = smov [#allocation2]   ;;  %s225_s16 = scalar_lea.hbm %s332_s1, 1024 }
   0x2   :  { %s17_s13 = sshll.u32 %s273_s12, 4  ;;  %p226_p0 = scmp.ne.s32.totalorder %s332_s1, %s225_s16  ;;  %s18_s13 = int_to_ptr.vmem [resolvable:$true] %s17_s13 }
   0x3   :  { %p229_p1 = scmp.lt.u32.totalorder %s225_s16, %s332_s1 }
   0x5   :  { %p231_p2 = pnand %p229_p1, %p226_p0 }
   0x7   :  { %234 = shalt.err (!%p231_p2)
}
   0x8   :  { %s235_s21 = scalar_lea.vmem %s18_s13, 1024  ;;  %p240_p4 = scmp.lt.s32.totalorder %s18_s13, %s18_s13 }
   0x9   :  { %p236_p3 = scmp.ne.s32.totalorder %s18_s13, %s235_s21  ;;  %p241_p5 = scmp.lt.s32.totalorder %s235_s21, %s235_s21 }
   0xb   :  { %p242_p6 = por %p241_p5, %p240_p4 }
   0xd   :  { %p243_p7 = pnand %p242_p6, %p236_p3 }
   0xf   :  { %246 = shalt.err (!%p243_p7)
}
  0x10   :  { %s274_s22 = smov 64   ;;  %s275_s23 = smov 4  }
  0x11   :  { %23 = dma.hbm_to_vmem [thread:$0]  %s332_s1, 1024, %s18_s13, [#allocation3], %s274_s22, %s274_s22, %s275_s23  }
  0x12   :  { %269 = dma.done.wait [#allocation3], 1024  }
  0x13   :  { %270 = vsyncadd [#allocation3], 4294966272  ;;  %v276_v0 = vmov 0.0   ;;  %vm277_vm0 = vmmov 0   ;;  %v216_v1 = vld [vmem:[#allocation2] sm:$0xff]   ;;  %v217_v2 = vld [vmem:[#allocation2 + $0x8] sm:$0xff]  }
  0x14   :  { %188 = vmatprep.subr.bf16.mxu0 %v276_v0  ;;  %204 = vmatprep.mubr.msk.bf16.mxu0 %vm277_vm0, %v276_v0  ;;  %v218_v3 = vld [vmem:[#allocation2 + $0x10] sm:$0xff]   ;;  %v219_v4 = vld [vmem:[#allocation2 + $0x18] sm:$0xff]   ;;  %v220_v5 = vld [vmem:[#allocation2 + $0x20] sm:$0xff]   ;;  %s278_s29 = smov [#allocation5]  }
  0x15   :  { %189 = vmatpush3.bf16.msra.mxu0 %v216_v1  ;;  %v221_v6 = vld [vmem:[#allocation2 + $0x28] sm:$0xff]   ;;  %v222_v7 = vld [vmem:[#allocation2 + $0x30] sm:$0xff]   ;;  %v223_v8 = vld [vmem:[#allocation2 + $0x38] sm:$0xff]   ;;  %s157_s30 = sshll.u32 %s278_s29, 4  ;;  %s158_s30 = int_to_ptr.vmem [resolvable:$true] %s157_s30 }
  0x16   :  { %190 = vmatprep.subr.bf16.mxu0 %v276_v0  ;;  %v224_v9 = vld [vmem:[%s331_s0] sm:$0xff]   ;;  %s247_s4 = scalar_lea.vmem %s158_s30, 256  ;;  %p252_p9 = scmp.lt.s32.totalorder %s158_s30, %s158_s30 }
  0x17   :  { %v169_v10 = vld [vmem:[%s333_s2] ss:$0 sm:$0xff]  ;;  %p248_p8 = scmp.ne.s32.totalorder %s158_s30, %s247_s4  ;;  %p253_p10 = scmp.lt.s32.totalorder %s247_s4, %s247_s4 }
  0x19   :  { %191 = vmatpush3.bf16.msra.mxu0 %v217_v2  ;;  %p254_p11 = por %p253_p10, %p252_p9 }
  0x1a   :  { %192 = vmatprep.subr.bf16.mxu0 %v276_v0 }
  0x1b   :  { %p255_p12 = pnand %p254_p11, %p248_p8 }
  0x1d   :  { %193 = vmatpush3.bf16.msra.mxu0 %v218_v3 }
  0x1e   :  { %194 = vmatprep.subr.bf16.mxu0 %v276_v0 }
  0x21   :  { %195 = vmatpush3.bf16.msra.mxu0 %v219_v4 }
  0x22   :  { %196 = vmatprep.subr.bf16.mxu0 %v276_v0 }
  0x25   :  { %197 = vmatpush3.bf16.msra.mxu0 %v220_v5 }
  0x26   :  { %198 = vmatprep.subr.bf16.mxu0 %v276_v0 }
  0x29   :  { %199 = vmatpush3.bf16.msra.mxu0 %v221_v6 }
  0x2a   :  { %200 = vmatprep.subr.bf16.mxu0 %v276_v0 }
  0x2d   :  { %201 = vmatpush3.bf16.msra.mxu0 %v222_v7 }
  0x2e   :  { %202 = vmatprep.subr.bf16.mxu0 %v276_v0 }
  0x31   :  { %203 = vmatpush3.bf16.msra.mxu0 %v223_v8 }
  0x34   :  { %205 = vmatmul.mubr.bf16.vlgmr.msra.gmra.mrb[0].mxu0 %v224_v9 }
 0x107   :  { %v143_v11 = vpop.f32.mrb[0].mxu0 }
 0x108   :  { %v144_v12 = vadd.f32 %v169_v10, %v143_v11  ;;  %v206_v13 = vpop.f32.mrb[1].mxu0 }
 0x109   :  { %v146_v14 = vpop.f32.mrb[2].mxu0 }
 0x10a   :  { %150 = vst [vmem:[#allocation5] sm:$0xff] %v144_v12  ;;  %v147_v15 = vadd.f32 %v169_v10, %v146_v14  ;;  %v207_v16 = vpop.f32.mrb[3].mxu0 }
 0x10c   :  { %151 = vst [vmem:[#allocation5 + $0x8] sm:$0xff] %v147_v15 }
 0x10d   :  { %258 = shalt.err (!%p255_p12)
}
 0x10e   :  { %s259_s5 = scalar_lea.hbm %s334_s3, 256 }
 0x10f   :  { %p260_p13 = scmp.ne.s32.totalorder %s334_s3, %s259_s5  ;;  %p263_p0 = scmp.lt.u32.totalorder %s259_s5, %s334_s3 }
 0x111   :  { %p265_p1 = pnand %p263_p0, %p260_p13 }
 0x113   :  { %268 = shalt.err (!%p265_p1)
}
 0x114   :  { %s279_s10 = smov 128   ;;  %s280_s11 = smov 8  }
 0x115   :  { %163 = dma.vmem_to_hbm [thread:$0]  %s158_s30, 256, %s334_s3, [#allocation4], %s279_s10, %s279_s10, %s280_s11  }
 0x116   :  { %271 = dma.done.wait [#allocation4], 256  }
 0x117   :  { %272 = vsyncadd [#allocation4], 4294967040 }
 0x118   :  { %167 = vsyncpa [#allocation3], 1 }
 0x119   :  { %168 = vsyncpa [#allocation4], 1 }

</bundles_post_ra>
